<compile_context>
chip_gen: v7x
topology: tpu7x:2x2x1
jax: 0.10.0
libtpu: 0.0.40
codegen_flags: <defaults>
</compile_context>

<pallas_src>
import functools
import math

import jax
import jax.numpy as jnp
from jax.experimental import pallas as pl
from jax.experimental.pallas import tpu as pltpu


def _round_up(v, m):
    return (v + m - 1) // m * m


def _sublane_multiple(dtype):
    # 8 for f32, 16 for bf16, 32 for int8/fp8 (sub-32-bit packs along sublanes).
    return max(8, 32 // jnp.dtype(dtype).itemsize)


def _vmem_budget_bytes():
    # Generation-aware VMEM budget: 64 MiB per TC on v7x, 128 MiB on v5e/v6e.
    cap = 128 * 1024 * 1024
    try:
        info = pltpu.get_tpu_info()
        cap = int(getattr(info, "vmem_capacity_bytes", cap))
    except Exception:
        pass
    return cap * 3 // 4  # leave headroom for compiler-internal scratch


# --------------------------------------------------------------------------- #
# Kernels
# --------------------------------------------------------------------------- #
def _eq_linear_kernel_inplace(x_ref, w_ref, b_ref, o_ref, *, scale):
    """f32 output: accumulate directly into the resident output block."""
    k = pl.program_id(2)

    @pl.when(k == 0)
    def _init():
        o_ref[...] = jnp.zeros_like(o_ref)

    o_ref[...] += jnp.dot(x_ref[...], w_ref[...],
                          preferred_element_type=jnp.float32)

    @pl.when(k == pl.num_programs(2) - 1)
    def _finalize():
        o_ref[...] = (o_ref[...] + b_ref[...]) * scale


def _eq_linear_kernel_scratch(x_ref, w_ref, b_ref, o_ref, acc_ref, *, scale):
    """Low-precision output: f32 VMEM accumulator, cast once in finalize."""
    k = pl.program_id(2)

    @pl.when(k == 0)
    def _init():
        acc_ref[...] = jnp.zeros_like(acc_ref)

    acc_ref[...] += jnp.dot(x_ref[...], w_ref[...],
                            preferred_element_type=jnp.float32)

    @pl.when(k == pl.num_programs(2) - 1)
    def _finalize():
        o_ref[...] = ((acc_ref[...] + b_ref[...]) * scale).astype(o_ref.dtype)


# --------------------------------------------------------------------------- #
# Per-layer weight preparation (do once, reuse across calls)
# --------------------------------------------------------------------------- #
def prepare_eq_linear(weight, bias, *, compute_dtype=jnp.bfloat16,
                      tn_max=512, tk_max=1024):
    """Transpose + pad + cast W once per layer; returns a reusable dict."""
    oc, ic = weight.shape
    tn = min(tn_max, _round_up(oc, 128))          # lane-dense N tile
    tk = min(tk_max, _round_up(ic, 128))          # lane-dense K tile
    icp = _round_up(ic, tk)
    ocp = _round_up(oc, tn)

    wt = jnp.transpose(weight)                    # (ic, oc): natural MXU RHS
    if (icp, ocp) != (ic, oc):
        wt = jnp.pad(wt, ((0, icp - ic), (0, ocp - oc)))
    if compute_dtype is not None:
        wt = wt.astype(compute_dtype)

    b = bias.reshape(1, oc).astype(jnp.float32)   # f32 epilogue (v5e-safe)
    if ocp != oc:
        b = jnp.pad(b, ((0, 0), (0, ocp - oc)))

    return dict(wt=wt, b=b, ic=ic, oc=oc, icp=icp, ocp=ocp, tn=tn, tk=tk,
                compute_dtype=compute_dtype)


# --------------------------------------------------------------------------- #
# Per-call apply
# --------------------------------------------------------------------------- #
def eq_linear_apply(prepared, x, scale, *, tm_max=512):
    ic, oc = prepared["ic"], prepared["oc"]
    icp, ocp = prepared["icp"], prepared["ocp"]
    tn, tk = prepared["tn"], prepared["tk"]
    wt, b = prepared["wt"], prepared["b"]
    compute_dtype = prepared["compute_dtype"]

    *lead, ic_x = x.shape
    assert ic_x == ic, f"expected last dim {ic}, got {ic_x}"
    m = math.prod(lead) if lead else 1
    out_dtype = x.dtype
    if m == 0:
        return jnp.zeros((*lead, oc), out_dtype)

    x2 = x.reshape(m, ic)
    if compute_dtype is not None:
        x2 = x2.astype(compute_dtype)
    in_dtype = x2.dtype
    sub = _sublane_multiple(in_dtype)

    # M tile: dtype-aware sublane multiple; prefer a tm that divides M exactly
    # so x is not copied just to pad M.
    m_aligned = _round_up(m, sub)
    if m_aligned <= tm_max:
        tm = m_aligned
    else:
        tm = 0
        t = (tm_max // sub) * sub
        while t >= sub:
            if m % t == 0:
                tm = t
                break
            t -= sub
        if tm == 0:
            tm = (tm_max // sub) * sub     # no clean divisor: pad last M block
    mp = _round_up(m, tm)

    # v7x megacore: with a single M block, split N into >=2 "parallel" blocks
    # so both TensorCores get work (no-op on single-TC v5e/v6e).
    if mp // tm == 1:
        while ocp // tn < 2 and tn % 2 == 0 and (tn // 2) % 128 == 0:
            tn //= 2

    # VMEM budget check (double-buffered inputs/outputs + optional f32 scratch).
    budget = _vmem_budget_bytes()
    in_item = jnp.dtype(in_dtype).itemsize
    out_item = jnp.dtype(out_dtype).itemsize
    use_inplace_acc = jnp.dtype(out_dtype) == jnp.dtype(jnp.float32)

    def est(tm_, tn_, tk_):
        e = (2 * (tm_ * tk_ + tk_ * tn_) * in_item   # double-buffered x, W.T
             + 2 * tn_ * 4                           # double-buffered bias
             + 2 * tm_ * tn_ * out_item)             # double-buffered output
        if not use_inplace_acc:
            e += tm_ * tn_ * 4                       # f32 accumulator scratch
        return e

    while (est(tm, tn, tk) > budget and tm > sub
           and tm % 2 == 0 and (tm // 2) % sub == 0):
        tm //= 2
        mp = _round_up(m, tm)

    # K padding is required for a correct reduction; M padding only if needed.
    if (mp, icp) != (m, ic):
        x2 = jnp.pad(x2, ((0, mp - m), (0, icp - ic)))

    grid = (mp // tm, ocp // tn, icp // tk)

    cost = pl.CostEstimate(
        flops=2 * mp * icp * ocp,
        transcendentals=0,
        bytes_accessed=int(mp * icp * in_item + icp * ocp * in_item
                           + ocp * 4 + mp * ocp * out_item),
    )
    vmem_limit = int(min(budget, max(2 * est(tm, tn, tk), 32 * 1024 * 1024)))

    in_specs = [
        pl.BlockSpec((tm, tk), lambda i, j, k: (i, k)),   # x tile
        pl.BlockSpec((tk, tn), lambda i, j, k: (k, j)),   # W.T tile
        pl.BlockSpec((1, tn), lambda i, j, k: (0, j)),    # bias tile
    ]
    out_spec = pl.BlockSpec((tm, tn), lambda i, j, k: (i, j))

    if use_inplace_acc:
        kernel = functools.partial(_eq_linear_kernel_inplace, scale=float(scale))
        scratch = []
    else:
        kernel = functools.partial(_eq_linear_kernel_scratch, scale=float(scale))
        scratch = [pltpu.VMEM((tm, tn), jnp.float32)]

    out = pl.pallas_call(
        kernel,
        out_shape=jax.ShapeDtypeStruct((mp, ocp), out_dtype),
        grid_spec=pltpu.PrefetchScalarGridSpec(
            num_scalar_prefetch=0,
            grid=grid,
            in_specs=in_specs,
            out_specs=out_spec,
            scratch_shapes=scratch,
        ),
        compiler_params=pltpu.CompilerParams(
            dimension_semantics=("parallel", "parallel", "arbitrary"),
            vmem_limit_bytes=vmem_limit,
        ),
        cost_estimate=cost,
    )(x2, wt, b)

    return out[:m, :oc].reshape(*lead, oc)


def eq_linear(x, weight, bias, scale, *, compute_dtype=jnp.bfloat16, tm_max=512):
    """Convenience one-shot path: y = (x @ weight.T + bias) * scale."""
    prepared = prepare_eq_linear(weight, bias, compute_dtype=compute_dtype)
    return eq_linear_apply(prepared, x, scale, tm_max=tm_max)


if __name__ == "__main__":
    # Module config: EqLinear(ic=32, oc=64) applied to x of shape (2, 8, 32).
    # NOTE: at this toy size everything fits one (16,128)x(128,128) tile; the
    # large-tile / pipelined path only pays off at production M/ic/oc.
    ic, oc = 32, 64
    batch, seq = 2, 8

    key = jax.random.PRNGKey(0)
    kx, kw = jax.random.split(key)

    # Deterministic synthetic parameters (torch.randn-like weight, zero bias).
    weight = jax.random.normal(kw, (oc, ic), dtype=jnp.float32)
    bias = jnp.zeros((oc,), dtype=jnp.float32)
    # nn.init.calculate_gain('linear') == 1.0
    scale = 1.0 * ((ic + oc) / 2.0) ** (-0.5)

    x = jax.random.normal(kx, (batch, seq, ic), dtype=jnp.float32)
    y_ref = (x @ weight.T + bias) * scale

    # Default path: bf16 MXU compute, f32 accumulation (prepare weight once,
    # reuse across calls).  Loosened tolerance vs f32 reference is expected.
    prep_bf16 = prepare_eq_linear(weight, bias)            # hoisted per-layer prep
    y_bf16 = eq_linear_apply(prep_bf16, x, scale)
    jax.block_until_ready(y_bf16)
    assert y_bf16.shape == (batch, seq, oc)
    assert jnp.allclose(y_bf16, y_ref, atol=5e-2, rtol=5e-2)

    # Exactness check of the same kernel structure with f32 compute.
    y_f32 = eq_linear(x, weight, bias, scale, compute_dtype=None)
    jax.block_until_ready(y_f32)
    assert y_f32.shape == (batch, seq, oc)
    assert jnp.allclose(y_f32, y_ref, atol=1e-5, rtol=1e-5)

    print("KERNEL_OK")
</pallas_src>

<mosaic_0001>
module attributes {stable_mosaic.version = 11 : i64} {
  func.func @_eq_linear_kernel_inplace(%arg0: i32, %arg1: i32, %arg2: i32, %arg3: memref<16x128xbf16, #tpu.memory_space<vmem>>, %arg4: memref<128x128xbf16, #tpu.memory_space<vmem>>, %arg5: memref<1x128xf32, #tpu.memory_space<vmem>>, %arg6: memref<16x128xf32, #tpu.memory_space<vmem>>) attributes {dimension_semantics = [#tpu.dimension_semantics<parallel>, #tpu.dimension_semantics<parallel>, #tpu.dimension_semantics<arbitrary>], iteration_bounds = array<i64: 1, 1, 1>, scalar_prefetch = 0 : i64, scratch_operands = 0 : i64, tpu.core_type = #tpu.core_type<tc>, window_params = [{transform_indices = @transform_0, window_bounds = array<i64: 16, 128>}, {transform_indices = @transform_1, window_bounds = array<i64: 128, 128>}, {transform_indices = @transform_2, window_bounds = array<i64: 1, 128>}, {transform_indices = @transform_3, window_bounds = array<i64: 16, 128>}]} {
    %c0_i32 = arith.constant 0 : i32
    %0 = arith.cmpi eq, %arg2, %c0_i32 : i32
    %1 = arith.extui %0 : i1 to i32
    %c0_i32_0 = arith.constant 0 : i32
    %2 = arith.cmpi ne, %1, %c0_i32_0 : i32
    scf.if %2 {
      %cst_10 = arith.constant 0.000000e+00 : f32
      %12 = vector.broadcast %cst_10 : f32 to vector<16x128xf32>
      %c0_11 = arith.constant 0 : index
      %c0_12 = arith.constant 0 : index
      %13 = vector.load %arg6[%c0_11, %c0_12] : memref<16x128xf32, #tpu.memory_space<vmem>>, vector<16x128xf32>
      tpu.vector_store %arg6[%c0_11, %c0_12], %12 {strides = array<i32>} : memref<16x128xf32, #tpu.memory_space<vmem>>, vector<16x128xf32>,
    } else {
    }
    %c0 = arith.constant 0 : index
    %c0_1 = arith.constant 0 : index
    %3 = vector.load %arg6[%c0, %c0_1] : memref<16x128xf32, #tpu.memory_space<vmem>>, vector<16x128xf32>
    %c0_2 = arith.constant 0 : index
    %c0_3 = arith.constant 0 : index
    %4 = vector.load %arg3[%c0_2, %c0_3] : memref<16x128xbf16, #tpu.memory_space<vmem>>, vector<16x128xbf16>
    %c0_4 = arith.constant 0 : index
    %c0_5 = arith.constant 0 : index
    %5 = vector.load %arg4[%c0_4, %c0_5] : memref<128x128xbf16, #tpu.memory_space<vmem>>, vector<128x128xbf16>
    %cst = arith.constant dense<0.000000e+00> : vector<16x128xf32>
    %6 = tpu.matmul %4, %5, %cst {dimension_numbers = #tpu.dot_dimension_numbers<[1], [0], [0], [1], [0, 0, 1, 1], [], []>} : vector<16x128xbf16>, vector<128x128xbf16>, vector<16x128xf32> -> vector<16x128xf32>
    %7 = arith.addf %3, %6 : vector<16x128xf32>
    %c0_6 = arith.constant 0 : index
    %c0_7 = arith.constant 0 : index
    %8 = vector.load %arg6[%c0_6, %c0_7] : memref<16x128xf32, #tpu.memory_space<vmem>>, vector<16x128xf32>
    tpu.vector_store %arg6[%c0_6, %c0_7], %7 {strides = array<i32>} : memref<16x128xf32, #tpu.memory_space<vmem>>, vector<16x128xf32>,
    %c0_i32_8 = arith.constant 0 : i32
    %9 = arith.cmpi eq, %arg2, %c0_i32_8 : i32
    %10 = arith.extui %9 : i1 to i32
    %c0_i32_9 = arith.constant 0 : i32
    %11 = arith.cmpi ne, %10, %c0_i32_9 : i32
    scf.if %11 {
      %c0_10 = arith.constant 0 : index
      %c0_11 = arith.constant 0 : index
      %12 = vector.load %arg6[%c0_10, %c0_11] : memref<16x128xf32, #tpu.memory_space<vmem>>, vector<16x128xf32>
      %c0_12 = arith.constant 0 : index
      %c0_13 = arith.constant 0 : index
      %13 = vector.load %arg5[%c0_12, %c0_13] : memref<1x128xf32, #tpu.memory_space<vmem>>, vector<1x128xf32>
      %14 = vector.broadcast %13 : vector<1x128xf32> to vector<16x128xf32>
      %15 = arith.addf %12, %14 : vector<16x128xf32>
      %cst_14 = arith.constant 0.144337565 : f32
      %16 = vector.broadcast %cst_14 : f32 to vector<16x128xf32>
      %17 = arith.mulf %15, %16 : vector<16x128xf32>
      %c0_15 = arith.constant 0 : index
      %c0_16 = arith.constant 0 : index
      %18 = vector.load %arg6[%c0_15, %c0_16] : memref<16x128xf32, #tpu.memory_space<vmem>>, vector<16x128xf32>
      tpu.vector_store %arg6[%c0_15, %c0_16], %17 {strides = array<i32>} : memref<16x128xf32, #tpu.memory_space<vmem>>, vector<16x128xf32>,
    } else {
    }
    return
  }
  func.func @transform_0(%arg0: i32, %arg1: i32, %arg2: i32) -> (i32, i32) {
    %c0_i32 = arith.constant 0 : i32
    return %arg0, %arg2 : i32, i32
  }
  func.func @transform_1(%arg0: i32, %arg1: i32, %arg2: i32) -> (i32, i32) {
    %c0_i32 = arith.constant 0 : i32
    return %arg2, %arg1 : i32, i32
  }
  func.func @transform_2(%arg0: i32, %arg1: i32, %arg2: i32) -> (i32, i32) {
    %c0_i32 = arith.constant 0 : i32
    %c0_i32_0 = arith.constant 0 : i32
    return %c0_i32, %arg1 : i32, i32
  }
  func.func @transform_3(%arg0: i32, %arg1: i32, %arg2: i32) -> (i32, i32) {
    %c0_i32 = arith.constant 0 : i32
    return %arg0, %arg1 : i32, i32
  }
}

</mosaic_0001>

<bundles_post_ra>
// kernel: tpu_custom_call.1
= control target key start
LH: loop header
LB: loop body
LE: loop exit
PB: predicated region body
PF: predicated region fallthrough
CT: control target
= control target key end

     0   :  { %8 = vsyncpa [#allocation3], 0  ;;  %s402_s0 = inlined_call_operand.hbm [shape: bf16[16,128], index: 0, kind: input, shape index: {}]   ;;  %s403_s1 = inlined_call_operand.hbm [shape: bf16[128,128], index: 1, kind: input, shape index: {}]   ;;  %s404_s2 = inlined_call_operand.vmem [shape: f32[1,128], index: 2, kind: input, shape index: {}]   ;;  %s405_s3 = inlined_call_operand.hbm [shape: f32[16,128], index: 3, kind: output, shape index: {}]  }
   0x1   :  { %9 = vsyncpa [#allocation6], 0 }
   0x2   :  { %10 = vsyncpa [#allocation4], 0  ;;  %s334_s12 = smov [#allocation2]   ;;  %s262_s16 = scalar_lea.hbm %s402_s0, 128 }
   0x3   :  { %s16_s13 = sshll.u32 %s334_s12, 4  ;;  %p263_p0 = scmp.ne.s32.totalorder %s402_s0, %s262_s16  ;;  %s17_s13 = int_to_ptr.vmem [resolvable:$true] %s16_s13 }
   0x4   :  { %p266_p1 = scmp.lt.u32.totalorder %s262_s16, %s402_s0 }
   0x6   :  { %p268_p2 = pnand %p266_p1, %p263_p0 }
   0x8   :  { %271 = shalt.err (!%p268_p2)
}
   0x9   :  { %s272_s21 = scalar_lea.vmem %s17_s13, 128  ;;  %p277_p4 = scmp.lt.s32.totalorder %s17_s13, %s17_s13 }
   0xa   :  { %p273_p3 = scmp.ne.s32.totalorder %s17_s13, %s272_s21  ;;  %p278_p5 = scmp.lt.s32.totalorder %s272_s21, %s272_s21 }
   0xc   :  { %p279_p6 = por %p278_p5, %p277_p4 }
   0xe   :  { %p280_p7 = pnand %p279_p6, %p273_p3 }
  0x10   :  { %283 = shalt.err (!%p280_p7)
}
  0x11   :  { %s335_s22 = smov 64   ;;  %s336_s23 = smov 4  }
  0x12   :  { %22 = dma.hbm_to_vmem [thread:$0]  %s402_s0, 128, %s17_s13, [#allocation3], %s335_s22, %s335_s22, %s336_s23  }
  0x13   :  { %s337_s26 = smov [#allocation5]   ;;  %s284_s30 = scalar_lea.hbm %s403_s1, 1024 }
  0x14   :  { %s28_s27 = sshll.u32 %s337_s26, 4  ;;  %p285_p8 = scmp.ne.s32.totalorder %s403_s1, %s284_s30  ;;  %s29_s27 = int_to_ptr.vmem [resolvable:$true] %s28_s27 }
  0x15   :  { %p288_p9 = scmp.lt.u32.totalorder %s284_s30, %s403_s1 }
  0x17   :  { %p290_p10 = pnand %p288_p9, %p285_p8 }
  0x19   :  { %293 = shalt.err (!%p290_p10)
}
  0x1a   :  { %s294_s8 = scalar_lea.vmem %s29_s27, 1024  ;;  %p299_p12 = scmp.lt.s32.totalorder %s29_s27, %s29_s27 }
  0x1b   :  { %p295_p11 = scmp.ne.s32.totalorder %s29_s27, %s294_s8  ;;  %p300_p13 = scmp.lt.s32.totalorder %s294_s8, %s294_s8 }
  0x1d   :  { %p301_p0 = por %p300_p13, %p299_p12 }
  0x1f   :  { %p302_p1 = pnand %p301_p0, %p295_p11 }
  0x21   :  { %305 = shalt.err (!%p302_p1)
}
  0x22   :  { %34 = dma.hbm_to_vmem [thread:$0]  %s403_s1, 1024, %s29_s27, [#allocation6], %s335_s22, %s335_s22, %s336_s23  }
  0x23   :  { %328 = dma.done.wait [#allocation3], 128  }
  0x24   :  { %329 = vsyncadd [#allocation3], 4294967168 }
  0x25   :  { %330 = dma.done.wait [#allocation6], 1024  }
  0x26   :  { %331 = vsyncadd [#allocation6], 4294966272  ;;  %v338_v0 = vmov 0.0   ;;  %vm339_vm0 = vmmov 0   ;;  %v253_v1 = vld [vmem:[#allocation5] sm:$0xff]   ;;  %v254_v2 = vld [vmem:[#allocation5 + $0x8] sm:$0xff]  }
  0x27   :  { %224 = vmatprep.subr.bf16.mxu0 %v338_v0  ;;  %240 = vmatprep.mubr.msk.bf16.mxu0 %vm339_vm0, %v338_v0  ;;  %v255_v3 = vld [vmem:[#allocation5 + $0x10] sm:$0xff]   ;;  %v256_v4 = vld [vmem:[#allocation5 + $0x18] sm:$0xff]   ;;  %v257_v5 = vld [vmem:[#allocation5 + $0x20] sm:$0xff]   ;;  %s340_s11 = smov [#allocation7]  }
  0x28   :  { %225 = vmatpush3.bf16.msra.mxu0 %v253_v1  ;;  %v258_v6 = vld [vmem:[#allocation5 + $0x28] sm:$0xff]   ;;  %v259_v7 = vld [vmem:[#allocation5 + $0x30] sm:$0xff]   ;;  %v260_v8 = vld [vmem:[#allocation5 + $0x38] sm:$0xff]   ;;  %s192_s12 = sshll.u32 %s340_s11, 4  ;;  %s193_s12 = int_to_ptr.vmem [resolvable:$true] %s192_s12 }
  0x29   :  { %226 = vmatprep.subr.bf16.mxu0 %v338_v0  ;;  %v261_v9 = vld [vmem:[#allocation2] sm:$0xff]   ;;  %s306_s13 = scalar_lea.vmem %s193_s12, 256  ;;  %p311_p3 = scmp.lt.s32.totalorder %s193_s12, %s193_s12 }
  0x2a   :  { %v214_v11 = vld [vmem:[%s404_s2] ss:$0 sm:$0xff]  ;;  %p307_p2 = scmp.ne.s32.totalorder %s193_s12, %s306_s13  ;;  %p312_p4 = scmp.lt.s32.totalorder %s306_s13, %s306_s13 }
  0x2c   :  { %227 = vmatpush3.bf16.msra.mxu0 %v254_v2  ;;  %p313_p5 = por %p312_p4, %p311_p3 }
  0x2d   :  { %228 = vmatprep.subr.bf16.mxu0 %v338_v0 }
  0x2e   :  { %p314_p6 = pnand %p313_p5, %p307_p2 }
  0x30   :  { %229 = vmatpush3.bf16.msra.mxu0 %v255_v3 }
  0x31   :  { %230 = vmatprep.subr.bf16.mxu0 %v338_v0 }
  0x34   :  { %231 = vmatpush3.bf16.msra.mxu0 %v256_v4 }
  0x35   :  { %232 = vmatprep.subr.bf16.mxu0 %v338_v0 }
  0x38   :  { %233 = vmatpush3.bf16.msra.mxu0 %v257_v5 }
  0x39   :  { %234 = vmatprep.subr.bf16.mxu0 %v338_v0 }
  0x3c   :  { %235 = vmatpush3.bf16.msra.mxu0 %v258_v6 }
  0x3d   :  { %236 = vmatprep.subr.bf16.mxu0 %v338_v0 }
  0x40   :  { %237 = vmatpush3.bf16.msra.mxu0 %v259_v7 }
  0x41   :  { %238 = vmatprep.subr.bf16.mxu0 %v338_v0 }
  0x44   :  { %239 = vmatpush3.bf16.msra.mxu0 %v260_v8 }
  0x47   :  { %241 = vmatmul.mubr.bf16.vlgmr.msra.gmra.mrb[0].mxu0 %v261_v9 }
 0x11a   :  { %v158_v10 = vpop.f32.mrb[0].mxu0 }
 0x11b   :  { %v242_v12 = vpop.f32.mrb[1].mxu0  ;;  %v181_v15 = vadd.f32 %v214_v11, %v158_v10 }
 0x11c   :  { %v161_v13 = vpop.f32.mrb[2].mxu0 }
 0x11d   :  { %v243_v14 = vpop.f32.mrb[3].mxu0  ;;  %v182_v16 = vadd.f32 %v214_v11, %v161_v13  ;;  %v183_v17 = vmul.f32 0.14433756, %v181_v15 }
 0x11f   :  { %v184_v18 = vmul.f32 0.14433756, %v182_v16  ;;  %185 = vst [vmem:[#allocation7] sm:$0xff] %v183_v17 }
 0x121   :  { %186 = vst [vmem:[#allocation7 + $0x8] sm:$0xff] %v184_v18 }
 0x122   :  { %317 = shalt.err (!%p314_p6)
}
 0x123   :  { %s318_s15 = scalar_lea.hbm %s405_s3, 256 }
 0x124   :  { %p319_p7 = scmp.ne.s32.totalorder %s405_s3, %s318_s15  ;;  %p322_p8 = scmp.lt.u32.totalorder %s318_s15, %s405_s3 }
 0x126   :  { %p324_p9 = pnand %p322_p8, %p319_p7 }
 0x128   :  { %327 = shalt.err (!%p324_p9)
}
 0x129   :  { %s341_s20 = smov 128   ;;  %s342_s21 = smov 8  }
 0x12a   :  { %198 = dma.vmem_to_hbm [thread:$0]  %s193_s12, 256, %s405_s3, [#allocation4], %s341_s20, %s341_s20, %s342_s21  }
 0x12b   :  { %332 = dma.done.wait [#allocation4], 256  }
 0x12c   :  { %333 = vsyncadd [#allocation4], 4294967040 }
 0x12d   :  { %202 = vsyncpa [#allocation3], 1 }
 0x12e   :  { %203 = vsyncpa [#allocation6], 1 }
 0x12f   :  { %204 = vsyncpa [#allocation4], 1 }

</bundles_post_ra>
